<compile_context>
chip_gen: v5e
topology: v5e:2x2
jax: 0.10.0
libtpu: 0.0.40
codegen_flags: <defaults>
</compile_context>

<pallas_src>
import functools

import jax
import jax.numpy as jnp
from jax import lax
from jax.experimental import pallas as pl
from jax.experimental.pallas import tpu as pltpu

EPS = 1e-5  # PyTorch GroupNorm default eps


# ----------------------- GroupNorm statistics (Pallas) -----------------------

def gn_stats_kernel(x_ref, sum_ref, sq_ref):
    # x_ref: (1, TS, C) channels-last tile; sum/sq: (1, 1, C) f32 accumulators
    # resident across the S (reduction) grid axis.
    @pl.when(pl.program_id(1) == 0)
    def _():
        sum_ref[...] = jnp.zeros_like(sum_ref)
        sq_ref[...] = jnp.zeros_like(sq_ref)

    x = x_ref[0].astype(jnp.float32)                       # (TS, C)
    sum_ref[0] += jnp.sum(x, axis=0, keepdims=True)        # (1, C)
    sq_ref[0] += jnp.sum(x * x, axis=0, keepdims=True)     # (1, C)


def _pick_s_tile(S, cap=2048):
    if S <= cap:
        return S
    for ts in (2048, 1024, 512, 256, 128, 64, 32, 16, 8):
        if S % ts == 0:
            return ts
    return S


def gn_channel_stats(x_flat):
    # x_flat: (B, S, C) -> per-channel (sum, sum_sq), each (B, 1, C) f32.
    B, S, C = x_flat.shape
    TS = _pick_s_tile(S)
    stat_spec = pl.BlockSpec((1, 1, C), lambda b, s: (b, 0, 0))
    return pl.pallas_call(
        gn_stats_kernel,
        out_shape=(jax.ShapeDtypeStruct((B, 1, C), jnp.float32),
                   jax.ShapeDtypeStruct((B, 1, C), jnp.float32)),
        grid=(B, S // TS),
        in_specs=[pl.BlockSpec((1, TS, C), lambda b, s: (b, s, 0))],
        out_specs=(stat_spec, stat_spec),
        compiler_params=pltpu.CompilerParams(
            dimension_semantics=("parallel", "arbitrary")),
    )(x_flat)


def gn_group_affine(sums, sqs, gamma, beta, groups, spatial):
    # Fold GroupNorm into a per-(batch, channel) affine:
    #   gn(x) * gamma + beta == x * scale + shift
    # Returned as one (B, 2, C) slab: [:, 0] = scale, [:, 1] = shift.
    B = sums.shape[0]
    C = sums.shape[-1]
    Cg = C // groups
    n = spatial * Cg
    gs = sums.reshape(B, groups, Cg).sum(-1)               # (B, G)
    gq = sqs.reshape(B, groups, Cg).sum(-1)
    mean = gs / n
    var = gq / n - mean * mean                             # biased var (PyTorch)
    inv = lax.rsqrt(var + EPS)                             # (B, G)
    g = gamma.astype(jnp.float32).reshape(1, groups, Cg)
    b = beta.astype(jnp.float32).reshape(1, groups, Cg)
    scale = (g * inv[:, :, None]).reshape(B, C)
    shift = (b - g * (mean * inv)[:, :, None]).reshape(B, C)
    return jnp.stack([scale, shift], axis=1)               # (B, 2, C)


# --------------- fused GN-affine + Swish + 3x3x3 conv (Pallas) ---------------

def _norm_swish_conv_acc(slab_refs, aff_ref, w_ref, d_idx, H, W, D):
    """GN affine + Swish + zero-pad mask + 27-tap conv accumulation.

    slab_refs: three (1, 1, H+2, W+2, Cin) refs = padded depth slices d, d+1, d+2
    of the spatially pre-padded activation.  Returns (H*W, Cout) f32.
    """
    Hp, Wp = H + 2, W + 2
    Cin = w_ref.shape[3]
    Cout = w_ref.shape[4]
    scale = aff_ref[0, 0].reshape(1, 1, Cin)
    shift = aff_ref[0, 1].reshape(1, 1, Cin)

    # mask = 1 on real voxels, 0 on the Conv3d zero-padding ring (padding is
    # applied AFTER GroupNorm+Swish in the reference module).
    hh = lax.broadcasted_iota(jnp.int32, (Hp, Wp, 1), 0)
    ww = lax.broadcasted_iota(jnp.int32, (Hp, Wp, 1), 1)
    hw_mask = ((hh >= 1) & (hh <= H) & (ww >= 1) & (ww <= W)).astype(jnp.float32)

    acc = jnp.zeros((H * W, Cout), jnp.float32)
    for kd in range(3):
        pd = d_idx + kd                                    # padded-depth index
        d_mask = jnp.logical_and(pd >= 1, pd <= D).astype(jnp.float32)
        x = slab_refs[kd][0, 0].astype(jnp.float32)        # (Hp, Wp, Cin)
        y = x * scale + shift                              # GroupNorm affine
        y = y * (1.0 / (1.0 + jnp.exp(-y)))                # Swish (EUP)
        y = y * (hw_mask * d_mask)                         # zero out conv padding
        for kh in range(3):
            for kw in range(3):
                tap = y[kh:kh + H, kw:kw + W, :].reshape(H * W, Cin)
                acc = acc + jnp.dot(tap, w_ref[kd, kh, kw],
                                    preferred_element_type=jnp.float32)
    return acc


def block1_kernel(x0_ref, x1_ref, x2_ref, aff_ref, w_ref, bias_ref,
                  o_ref, *, H, W, D):
    acc = _norm_swish_conv_acc((x0_ref, x1_ref, x2_ref), aff_ref, w_ref,
                               pl.program_id(1), H, W, D)
    acc = acc + bias_ref[...]                              # conv bias + time proj
    Cout = w_ref.shape[4]
    o_ref[0, 0] = acc.reshape(H, W, Cout).astype(o_ref.dtype)


def block2_res_kernel(x0_ref, x1_ref, x2_ref, aff_ref, w_ref, bias_ref,
                      res_ref, wr_ref, o_ref, *, H, W, D):
    acc = _norm_swish_conv_acc((x0_ref, x1_ref, x2_ref), aff_ref, w_ref,
                               pl.program_id(1), H, W, D)
    acc = acc + bias_ref[...]                              # conv bias + res bias
    Cin = wr_ref.shape[0]
    Cout = w_ref.shape[4]
    xres = res_ref[0, 0].astype(jnp.float32).reshape(H * W, Cin)
    acc = acc + jnp.dot(xres, wr_ref[...], preferred_element_type=jnp.float32)
    o_ref[0, 0] = acc.reshape(H, W, Cout).astype(o_ref.dtype)


def block2_identity_kernel(x0_ref, x1_ref, x2_ref, aff_ref, w_ref, bias_ref,
                           res_ref, o_ref, *, H, W, D):
    acc = _norm_swish_conv_acc((x0_ref, x1_ref, x2_ref), aff_ref, w_ref,
                               pl.program_id(1), H, W, D)
    acc = acc + bias_ref[...]
    Cout = w_ref.shape[4]
    acc = acc + res_ref[0, 0].astype(jnp.float32).reshape(H * W, Cout)  # no matmul
    o_ref[0, 0] = acc.reshape(H, W, Cout).astype(o_ref.dtype)


def block_conv(x_pad, affine, w_dhwio, bias_rows, out_dtype, res=None, wr=None):
    # x_pad: (B, D+2, H+2, W+2, Cin) spatially pre-padded, channels-last
    # affine: (B, 2, Cin) GN scale/shift; w_dhwio: (3,3,3,Cin,Cout)
    # bias_rows: (B, Cout); res: (B, D, H, W, Cres) residual input (block2 only)
    # wr: (Cres, Cout) 1x1x1 residual conv weight (bias already folded into bias_rows).
    B, Dp, Hp, Wp, Cin = x_pad.shape
    D, H, W = Dp - 2, Hp - 2, Wp - 2
    Cout = w_dhwio.shape[-1]

    def slab_spec(kd):
        return pl.BlockSpec((1, 1, Hp, Wp, Cin),
                            lambda b, d: (b, d + kd, 0, 0, 0))

    in_specs = [slab_spec(0), slab_spec(1), slab_spec(2),
                pl.BlockSpec((1, 2, Cin), lambda b, d: (b, 0, 0)),
                pl.BlockSpec((3, 3, 3, Cin, Cout), lambda b, d: (0, 0, 0, 0, 0)),
                pl.BlockSpec((1, Cout), lambda b, d: (b, 0))]
    args = [x_pad, x_pad, x_pad, affine, w_dhwio, bias_rows]

    if res is None:
        kernel = functools.partial(block1_kernel, H=H, W=W, D=D)
    else:
        Cres = res.shape[-1]
        in_specs.append(pl.BlockSpec((1, 1, H, W, Cres),
                                     lambda b, d: (b, d, 0, 0, 0)))
        args.append(res)
        if wr is not None:
            in_specs.append(pl.BlockSpec((Cres, Cout), lambda b, d: (0, 0)))
            args.append(wr)
            kernel = functools.partial(block2_res_kernel, H=H, W=W, D=D)
        else:
            kernel = functools.partial(block2_identity_kernel, H=H, W=W, D=D)

    return pl.pallas_call(
        kernel,
        out_shape=jax.ShapeDtypeStruct((B, D, H, W, Cout), out_dtype),
        grid=(B, D),
        in_specs=in_specs,
        out_specs=pl.BlockSpec((1, 1, H, W, Cout), lambda b, d: (b, d, 0, 0, 0)),
        compiler_params=pltpu.CompilerParams(
            dimension_semantics=("parallel", "parallel"),
            vmem_limit_bytes=32 * 1024 * 1024),
    )(*args)


# ------------------------------- forward pass --------------------------------

def resnet_block_forward(x, time_emb, P):
    # x: (B, Cin, D, H, W) NCDHW (PyTorch convention); time_emb: (B, Te)
    B, Cin, D, H, W = x.shape
    S = D * H * W
    G = P["groups"]
    Cout = P["w1"].shape[0]

    x_cl = jnp.transpose(x, (0, 2, 3, 4, 1))                     # (B, D, H, W, Cin)
    pad = ((0, 0), (1, 1), (1, 1), (1, 1), (0, 0))

    # ---- block1: GN stats -> fused [GN affine + Swish + conv3x3x3 + time bias]
    s1, q1 = gn_channel_stats(x_cl.reshape(B, S, Cin))
    aff1 = gn_group_affine(s1, q1, P["gn1_g"], P["gn1_b"], G, S)  # (B, 2, Cin)
    w1m = jnp.transpose(P["w1"], (2, 3, 4, 1, 0))                # (3,3,3,Cin,Cout)
    te = time_emb.astype(jnp.float32)
    tproj = (te * jax.nn.sigmoid(te)) @ P["wt"].T + P["bt"]      # hoisted mlp(temb)
    bias1 = tproj + P["b1"][None, :]                             # (B, Cout)
    h1 = block_conv(jnp.pad(x_cl, pad), aff1, w1m, bias1, x.dtype)

    # ---- block2: GN stats -> fused [GN affine + Swish + conv3x3x3 + residual]
    # TODO(synk): nn.Dropout(dropout) is a training-time op; dropout=0 -> Identity.
    s2, q2 = gn_channel_stats(h1.reshape(B, S, Cout))
    aff2 = gn_group_affine(s2, q2, P["gn2_g"], P["gn2_b"], G, S)  # (B, 2, Cout)
    w2m = jnp.transpose(P["w2"], (2, 3, 4, 1, 0))                # (3,3,3,Cout,Cout)
    if P["wr"] is not None:
        wr = P["wr"].reshape(Cout, Cin).T                        # (Cin, Cout)
        bias2 = jnp.tile((P["b2"] + P["br"])[None, :], (B, 1)).astype(jnp.float32)
        out = block_conv(jnp.pad(h1, pad), aff2, w2m, bias2, x.dtype,
                         res=x_cl, wr=wr)
    else:
        bias2 = jnp.tile(P["b2"][None, :], (B, 1)).astype(jnp.float32)
        out = block_conv(jnp.pad(h1, pad), aff2, w2m, bias2, x.dtype,
                         res=x_cl)
    return jnp.transpose(out, (0, 4, 1, 2, 3))                   # back to NCDHW


# --------------------------- pure-JAX reference ------------------------------

def ref_gn_swish(x, gamma, beta, G):
    B, C, D, H, W = x.shape
    xg = x.reshape(B, G, C // G, D, H, W)
    mean = xg.mean(axis=(2, 3, 4, 5), keepdims=True)
    var = ((xg - mean) ** 2).mean(axis=(2, 3, 4, 5), keepdims=True)
    xn = ((xg - mean) / jnp.sqrt(var + EPS)).reshape(B, C, D, H, W)
    y = xn * gamma[None, :, None, None, None] + beta[None, :, None, None, None]
    return y * jax.nn.sigmoid(y)


def ref_conv3d(x, w, b, pad):
    out = jax.lax.conv_general_dilated(
        x, w, (1, 1, 1), [(pad, pad)] * 3,
        dimension_numbers=("NCDHW", "OIDHW", "NCDHW"))
    return out + b[None, :, None, None, None]


def ref_forward(x, temb, P):
    h = ref_conv3d(ref_gn_swish(x, P["gn1_g"], P["gn1_b"], P["groups"]),
                   P["w1"], P["b1"], 1)
    t = temb * jax.nn.sigmoid(temb)
    h = h + (t @ P["wt"].T + P["bt"])[:, :, None, None, None]
    h = ref_conv3d(ref_gn_swish(h, P["gn2_g"], P["gn2_b"], P["groups"]),
                   P["w2"], P["b2"], 1)
    res = ref_conv3d(x, P["wr"], P["br"], 0) if P["wr"] is not None else x
    return h + res


# ------------------------------------ main ------------------------------------

if __name__ == "__main__":
    def make_params(key, dim, dim_out, groups, te_dim):
        ks = jax.random.split(key, 12)
        has_res = dim != dim_out
        return dict(
            groups=groups,
            gn1_g=1.0 + 0.1 * jax.random.normal(ks[0], (dim,), jnp.float32),
            gn1_b=0.1 * jax.random.normal(ks[1], (dim,), jnp.float32),
            w1=0.1 * jax.random.normal(ks[2], (dim_out, dim, 3, 3, 3), jnp.float32),
            b1=0.1 * jax.random.normal(ks[3], (dim_out,), jnp.float32),
            wt=0.1 * jax.random.normal(ks[4], (dim_out, te_dim), jnp.float32),
            bt=0.1 * jax.random.normal(ks[5], (dim_out,), jnp.float32),
            gn2_g=1.0 + 0.1 * jax.random.normal(ks[6], (dim_out,), jnp.float32),
            gn2_b=0.1 * jax.random.normal(ks[7], (dim_out,), jnp.float32),
            w2=0.1 * jax.random.normal(ks[8], (dim_out, dim_out, 3, 3, 3), jnp.float32),
            b2=0.1 * jax.random.normal(ks[9], (dim_out,), jnp.float32),
            wr=(0.1 * jax.random.normal(ks[10], (dim_out, dim, 1, 1, 1), jnp.float32)
                if has_res else None),
            br=(0.1 * jax.random.normal(ks[11], (dim_out,), jnp.float32)
                if has_res else None),
        )

    B, D, H, W, te_dim = 2, 4, 8, 8, 8
    k1, k2, kx, kt = jax.random.split(jax.random.PRNGKey(0), 4)
    temb = jax.random.normal(kt, (B, te_dim), jnp.float32)

    # case 1: dim != dim_out -> residual 1x1x1 conv path
    dim, dim_out, groups = 4, 8, 2
    P = make_params(k1, dim, dim_out, groups, te_dim)
    x = jax.random.normal(kx, (B, dim, D, H, W), jnp.float32)
    out = jax.block_until_ready(resnet_block_forward(x, temb, P))
    ref = ref_forward(x, temb, P)
    assert out.shape == ref.shape == (B, dim_out, D, H, W)
    err = float(jnp.max(jnp.abs(out - ref)))
    assert err < 2e-3, f"residual-conv path mismatch: {err}"

    # case 2: dim == dim_out -> identity residual (plain add, no eye matmul)
    P2 = make_params(k2, dim_out, dim_out, groups, te_dim)
    x2 = jax.random.normal(kx, (B, dim_out, D, H, W), jnp.float32)
    out2 = jax.block_until_ready(resnet_block_forward(x2, temb, P2))
    ref2 = ref_forward(x2, temb, P2)
    err2 = float(jnp.max(jnp.abs(out2 - ref2)))
    assert err2 < 2e-3, f"identity-residual path mismatch: {err2}"

    print("KERNEL_OK")
</pallas_src>

<mosaic_0001>
module attributes {stable_mosaic.version = 11 : i64} {
  func.func @gn_stats_kernel(%arg0: i32, %arg1: i32, %arg2: memref<1x256x4xf32, #tpu.memory_space<vmem>>, %arg3: memref<1x1x4xf32, #tpu.memory_space<vmem>>, %arg4: memref<1x1x4xf32, #tpu.memory_space<vmem>>) attributes {dimension_semantics = [#tpu.dimension_semantics<parallel>, #tpu.dimension_semantics<arbitrary>], iteration_bounds = array<i64: 2, 1>, scalar_prefetch = 0 : i64, scratch_operands = 0 : i64, tpu.core_type = #tpu.core_type<tc>, window_params = [{transform_indices = @transform_0, window_bounds = array<i64: 1, 256, 4>}, {transform_indices = @transform_1, window_bounds = array<i64: 1, 1, 4>}, {transform_indices = @transform_2, window_bounds = array<i64: 1, 1, 4>}]} {
    %c0_i32 = arith.constant 0 : i32
    %0 = arith.cmpi eq, %arg1, %c0_i32 : i32
    %1 = arith.extui %0 : i1 to i32
    %c0_i32_0 = arith.constant 0 : i32
    %2 = arith.cmpi ne, %1, %c0_i32_0 : i32
    scf.if %2 {
      %cst_16 = arith.constant 0.000000e+00 : f32
      %22 = vector.broadcast %cst_16 : f32 to vector<1x1x4xf32>
      %c0_17 = arith.constant 0 : index
      %c0_18 = arith.constant 0 : index
      %c0_19 = arith.constant 0 : index
      %23 = vector.load %arg3[%c0_17, %c0_18, %c0_19] : memref<1x1x4xf32, #tpu.memory_space<vmem>>, vector<1x1x4xf32>
      tpu.vector_store %arg3[%c0_17, %c0_18, %c0_19], %22 {strides = array<i32>} : memref<1x1x4xf32, #tpu.memory_space<vmem>>, vector<1x1x4xf32>,
      %cst_20 = arith.constant 0.000000e+00 : f32
      %24 = vector.broadcast %cst_20 : f32 to vector<1x1x4xf32>
      %c0_21 = arith.constant 0 : index
      %c0_22 = arith.constant 0 : index
      %c0_23 = arith.constant 0 : index
      %25 = vector.load %arg4[%c0_21, %c0_22, %c0_23] : memref<1x1x4xf32, #tpu.memory_space<vmem>>, vector<1x1x4xf32>
      tpu.vector_store %arg4[%c0_21, %c0_22, %c0_23], %24 {strides = array<i32>} : memref<1x1x4xf32, #tpu.memory_space<vmem>>, vector<1x1x4xf32>,
    } else {
    }
    %c0 = arith.constant 0 : index
    %c0_1 = arith.constant 0 : index
    %c0_2 = arith.constant 0 : index
    %3 = vector.load %arg2[%c0, %c0_1, %c0_2] : memref<1x256x4xf32, #tpu.memory_space<vmem>>, vector<1x256x4xf32>
    %4 = vector.shape_cast %3 : vector<1x256x4xf32> to vector<256x4xf32>
    %c0_3 = arith.constant 0 : index
    %c0_4 = arith.constant 0 : index
    %c0_5 = arith.constant 0 : index
    %5 = vector.load %arg3[%c0_3, %c0_4, %c0_5] : memref<1x1x4xf32, #tpu.memory_space<vmem>>, vector<1x1x4xf32>
    %6 = vector.shape_cast %5 : vector<1x1x4xf32> to vector<1x4xf32>
    %cst = arith.constant dense<0.000000e+00> : vector<4xf32>
    %7 = vector.multi_reduction <add>, %4, %cst [0] : vector<256x4xf32> to vector<4xf32>
    %8 = vector.shape_cast %7 : vector<4xf32> to vector<1x4xf32>
    %9 = arith.addf %6, %8 : vector<1x4xf32>
    %c0_6 = arith.constant 0 : index
    %c0_7 = arith.constant 0 : index
    %c0_8 = arith.constant 0 : index
    %10 = vector.load %arg3[%c0_6, %c0_7, %c0_8] : memref<1x1x4xf32, #tpu.memory_space<vmem>>, vector<1x1x4xf32>
    %11 = vector.shape_cast %10 : vector<1x1x4xf32> to vector<1x4xf32>
    %12 = vector.shape_cast %9 : vector<1x4xf32> to vector<1x1x4xf32>
    tpu.vector_store %arg3[%c0_6, %c0_7, %c0_8], %12 {strides = array<i32>} : memref<1x1x4xf32, #tpu.memory_space<vmem>>, vector<1x1x4xf32>,
    %c0_9 = arith.constant 0 : index
    %c0_10 = arith.constant 0 : index
    %c0_11 = arith.constant 0 : index
    %13 = vector.load %arg4[%c0_9, %c0_10, %c0_11] : memref<1x1x4xf32, #tpu.memory_space<vmem>>, vector<1x1x4xf32>
    %14 = vector.shape_cast %13 : vector<1x1x4xf32> to vector<1x4xf32>
    %15 = arith.mulf %4, %4 : vector<256x4xf32>
    %cst_12 = arith.constant dense<0.000000e+00> : vector<4xf32>
    %16 = vector.multi_reduction <add>, %15, %cst_12 [0] : vector<256x4xf32> to vector<4xf32>
    %17 = vector.shape_cast %16 : vector<4xf32> to vector<1x4xf32>
    %18 = arith.addf %14, %17 : vector<1x4xf32>
    %c0_13 = arith.constant 0 : index
    %c0_14 = arith.constant 0 : index
    %c0_15 = arith.constant 0 : index
    %19 = vector.load %arg4[%c0_13, %c0_14, %c0_15] : memref<1x1x4xf32, #tpu.memory_space<vmem>>, vector<1x1x4xf32>
    %20 = vector.shape_cast %19 : vector<1x1x4xf32> to vector<1x4xf32>
    %21 = vector.shape_cast %18 : vector<1x4xf32> to vector<1x1x4xf32>
    tpu.vector_store %arg4[%c0_13, %c0_14, %c0_15], %21 {strides = array<i32>} : memref<1x1x4xf32, #tpu.memory_space<vmem>>, vector<1x1x4xf32>,
    return
  }
  func.func @transform_0(%arg0: i32, %arg1: i32) -> (i32, i32, i32) {
    %c0_i32 = arith.constant 0 : i32
    %c0_i32_0 = arith.constant 0 : i32
    return %arg0, %arg1, %c0_i32 : i32, i32, i32
  }
  func.func @transform_1(%arg0: i32, %arg1: i32) -> (i32, i32, i32) {
    %c0_i32 = arith.constant 0 : i32
    %c0_i32_0 = arith.constant 0 : i32
    %c0_i32_1 = arith.constant 0 : i32
    return %arg0, %c0_i32, %c0_i32_0 : i32, i32, i32
  }
  func.func @transform_2(%arg0: i32, %arg1: i32) -> (i32, i32, i32) {
    %c0_i32 = arith.constant 0 : i32
    %c0_i32_0 = arith.constant 0 : i32
    %c0_i32_1 = arith.constant 0 : i32
    return %arg0, %c0_i32, %c0_i32_0 : i32, i32, i32
  }
}

</mosaic_0001>

<bundles_post_ra>
// kernel: tpu_custom_call.1
= control target key start
LH: loop header
LB: loop body
LE: loop exit
PB: predicated region body
PF: predicated region fallthrough
CT: control target
= control target key end

     0   :  { %8 = vsyncpa [#allocation3], 0  ;;  %s953_s0 = inlined_call_operand.vmem [shape: f32[2,256,4], index: 0, kind: input, shape index: {}]   ;;  %s954_s1 = inlined_call_operand.hbm [shape: f32[2,1,4], index: 1, kind: output, shape index: {0}]   ;;  %s955_s2 = inlined_call_operand.hbm [shape: f32[2,1,4], index: 2, kind: output, shape index: {1}]  }
   0x1   :  { %10 = vsyncpa [#allocation3 + $0x1], 0 }
   0x2   :  { %11 = vsyncpa [#allocation5], 0 }
   0x3   :  { %13 = vsyncpa [#allocation5 + $0x1], 0  ;;  %s722_s9 = smov 0   ;;  %s724_s10 = smov 0  }
   0x4   :  { %s726_s11 = smov 0   ;;  %s728_s12 = smov 0  }
   0x5   :  { %s730_s13 = smov 0   ;;  %s732_s14 = smov 0  }
   0x6 LB: > { %s523_s15 = sadd.s32 4294967295, %s704_s14   ;;  %s524_s16 = sadd.s32 4294967294, %s704_s14   ;;  %s704_s14 = sphi %s732_s14, %s19_s14   ;;  %s700_s13 = sphi %s730_s13, %s962_s13   ;;  %s696_s12 = sphi %s728_s12, %s961_s12   ;;  %s692_s11 = sphi %s726_s11, %s960_s11   ;;  %s688_s10 = sphi %s724_s10, %s959_s10   ;;  %s684_s9 = sphi %s722_s9, %s958_s9  }
   0x7   : > { %s31_s17 = sadd.s32 1, %s700_s13  ;;  %s66_s18 = sadd.s32 1, %s692_s11 }
   0x8   : > { %p33_p0 = scmp.ge.s32.totalorder %s31_s17, 2  ;;  %p76_p1 = scmp.ne.s32.totalorder %s692_s11, %s688_s10 }
   0x9   : > { %p77_p2 = scmp.eq.s32.totalorder %s523_s15, 1  ;;  %p82_p3 = scmp.ne.s32.totalorder %s688_s10, %s684_s9 }
   0xa   : > { %s964_s17 = smov (%p33_p0, %s31_s17), 0  ;;  %p83_p5 = scmp.eq.s32.totalorder %s524_s16, 1 }
   0xb   : > { %p762_p4 = por %p77_p2, %p76_p1  ;;  %s63_s20 = ssub.s32 %s700_s13, %s964_s17 }
   0xc   : > { %p527_p6 = scmp.ge.s32.totalorder %s704_s14, 1  ;;  %p64_p7 = scmp.eq.s32.totalorder %s63_s20, 0 }
   0xd   : > { %p769_p8 = por %p83_p5, %p82_p3  ;;  %p140_p9 = scmp.lt.s32.totalorder %s704_s14, 3 }
   0xe   : > { %s775_s22 = scalar_select %p64_p7, %s692_s11, %s66_s18  }
   0xf   : > { %p141_p10 = pnand %p527_p6, %p140_p9 }
  0x10   : > { %s778_s23 = sand.u32 (!%p141_p10), 1, %s688_s10   ;;  %p170_p11 = scmp.lt.s32.totalorder (!%p141_p10), %s696_s12, 1 }
  0x11   : > { %144 = sbr.rel (%p141_p10) target bundleno = 121 (0x79), region = 24  ;;  %s782_s24 = scalar_lea.vmem (!%p141_p10), [#allocation2], %s778_s23 }
  0x12   : > { %s788_s26 = scalar_lea.vmem (!%p141_p10), [#allocation4], %s778_s23  ;;  %s409_s5 = scalar_lea.hbm (!%p141_p10), %s954_s1, %s696_s12 }
  0x13   : > { %s411_s6 = sshll.u32 (!%p141_p10), %s782_s24, 4  ;;  %s413_s7 = sshll.u32 (!%p141_p10), %s409_s5, 4  ;;  %s412_s6 = int_to_ptr.vmem [resolvable:$true] %s411_s6  ;;  %s414_s7 = int_to_ptr.hbm [resolvable:$true] %s413_s7 }
  0x14   : > { %s397_s8 = scalar_lea.sflag (!%p141_p10), [#allocation3], %s778_s23  ;;  %s608_s15 = sshra.s32 (!%p141_p10), %s414_s7, 4  ;;  %s609_s15 = int_to_ptr.hbm [resolvable:$true] %s608_s15 }
  0x15   : > { %s610_s16 = scalar_lea.hbm (!%p141_p10), %s609_s15, 1  ;;  %p615_p1 = scmp.lt.s32.totalorder (!%p141_p10), %s609_s15, %s954_s1 }
  0x16   : > { %vm183_vm0 = vcmask 24576   ;;  %v706_v0 = vmov 0.0   ;;  %s171_s25 = scalar_select %p170_p11, %s696_s12, 1  ;;  %vm219_vm1 = vcmask 31744  }
  0x17   : > { %184 = vst.msk [vmem:[%s782_s24] sm:$0x1] %vm183_vm0, %v706_v0  ;;  %p611_p12 = scmp.ne.s32.totalorder %s609_s15, %s610_s16 }
  0x18   : > { %185 = vst.msk [vmem:[%s788_s26] sm:$0x1] %vm183_vm0, %v706_v0  ;;  %s532_s27 = sshll.u32 %s171_s25, 8  ;;  %s614_s25 = scalar_lea.hbm %s954_s1, 2 }
  0x19   : > { %s795_s30 = scalar_lea.vmem %s953_s0, %s532_s27  ;;  %p612_p13 = pnand %p611_p12, %p762_p4 }
  0x1a   : > { %v186_v1 = vld [vmem:[%s795_s30] sm:$0xff]  ;;  %v187_v2 = vld [vmem:[%s795_s30 + $0x8] sm:$0xff]  ;;  %v188_v3 = vld [vmem:[%s795_s30 + $0x10] sm:$0xff]  ;;  %p616_p2 = scmp.lt.s32.totalorder %s614_s25, %s610_s16 }
  0x1b   : > { %v220_v4 = vsel %vm219_vm1, %v186_v1, 0.0  ;;  %v221_v5 = vsel %vm219_vm1, %v187_v2, 0.0  ;;  %v223_v6 = vsel %vm219_vm1, %v188_v3, 0.0  ;;  %v189_v7 = vld [vmem:[%s795_s30 + $0x18] sm:$0xff]  ;;  %v190_v10 = vld [vmem:[%s795_s30 + $0x20] sm:$0xff]  ;;  %v191_v13 = vld [vmem:[%s795_s30 + $0x28] sm:$0xff]  ;;  %v293_v21 = vmul.f32 %v186_v1, %v186_v1  ;;  %p613_p0 = pneg %p612_p13 }
  0x1c   : > { %v222_v8 = vadd.f32 %v221_v5, %v220_v4  ;;  %v225_v9 = vsel %vm219_vm1, %v189_v7, 0.0  ;;  %v227_v12 = vsel %vm219_vm1, %v190_v10, 0.0  ;;  %v229_v15 = vsel %vm219_vm1, %v191_v13, 0.0  ;;  %v192_v16 = vld [vmem:[%s795_s30 + $0x30] sm:$0xff]  ;;  %v193_v19 = vld [vmem:[%s795_s30 + $0x38] sm:$0xff]  ;;  %v194_v25 = vld [vmem:[%s795_s30 + $0x40] sm:$0xff]  ;;  %p617_p3 = por %p616_p2, %p615_p1 }
  0x1d   : > { %v231_v18 = vsel %vm219_vm1, %v192_v16, 0.0  ;;  %v233_v22 = vsel %vm219_vm1, %v193_v19, 0.0  ;;  %v294_v23 = vmul.f32 %v187_v2, %v187_v2  ;;  %v295_v24 = vmul.f32 %v188_v3, %v188_v3  ;;  %v195_v29 = vld [vmem:[%s795_s30 + $0x48] sm:$0xff]  ;;  %v196_v36 = vld [vmem:[%s795_s30 + $0x50] sm:$0xff]  ;;  %v197_v42 = vld [vmem:[%s795_s30 + $0x58] sm:$0xff] }
  0x1e   : > { %v224_v11 = vadd.f32 %v223_v6, %v222_v8  ;;  %v235_v27 = vsel %vm219_vm1, %v194_v25, 0.0  ;;  %v296_v28 = vmul.f32 %v189_v7, %v189_v7  ;;  %v325_v31 = vsel %vm219_vm1, %v293_v21, 0.0  ;;  %v198_v48 = vld [vmem:[%s795_s30 + $0x60] sm:$0xff]  ;;  %v199_v54 = vld [vmem:[%s795_s30 + $0x68] sm:$0xff]  ;;  %v200_v60 = vld [vmem:[%s795_s30 + $0x70] sm:$0xff]  ;;  %p618_p5 = pnand %p617_p3, %p613_p0 }
  0x1f   : > { %v237_v32 = vsel %vm219_vm1, %v195_v29, 0.0  ;;  %v297_v33 = vmul.f32 %v190_v10, %v190_v10  ;;  %v326_v34 = vsel %vm219_vm1, %v294_v23, 0.0  ;;  %v328_v35 = vsel %vm219_vm1, %v295_v24, 0.0  ;;  %v201_v2 = vld [vmem:[%s795_s30 + $0x78] sm:$0xff]  ;;  %v202_v8 = vld [vmem:[%s795_s30 + $0x80] sm:$0xff] }
  0x20   : > { %v226_v14 = vadd.f32 %v225_v9, %v224_v11  ;;  %v327_v38 = vadd.f32 %v326_v34, %v325_v31  ;;  %v239_v39 = vsel %vm219_vm1, %v196_v36, 0.0  ;;  %v298_v40 = vmul.f32 %v191_v13, %v191_v13 }
  0x21   : > { %v330_v41 = vsel %vm219_vm1, %v296_v28, 0.0  ;;  %v241_v45 = vsel %vm219_vm1, %v197_v42, 0.0  ;;  %v299_v46 = vmul.f32 %v192_v16, %v192_v16  ;;  %v332_v47 = vsel %vm219_vm1, %v297_v33, 0.0 }
  0x22   : > { %v228_v17 = vadd.f32 %v227_v12, %v226_v14  ;;  %v329_v44 = vadd.f32 %v328_v35, %v327_v38  ;;  %v243_v51 = vsel %vm219_vm1, %v198_v48, 0.0  ;;  %v300_v52 = vmul.f32 %v193_v19, %v193_v19  ;;  %v203_v14 = vld [vmem:[%s795_s30 + $0x88] sm:$0xff] }
  0x23   : > { %v334_v53 = vsel %vm219_vm1, %v298_v40, 0.0  ;;  %v245_v57 = vsel %vm219_vm1, %v199_v54, 0.0  ;;  %v301_v58 = vmul.f32 %v194_v25, %v194_v25  ;;  %v336_v59 = vsel %vm219_vm1, %v299_v46, 0.0  ;;  %v207_v38 = vld [vmem:[%s795_s30 + $0xa8] sm:$0xff] }
  0x24   : > { %v230_v20 = vadd.f32 %v229_v15, %v228_v17  ;;  %v331_v50 = vadd.f32 %v330_v41, %v329_v44  ;;  %v247_v63 = vsel %vm219_vm1, %v200_v60, 0.0  ;;  %v302_v0 = vmul.f32 %v195_v29, %v195_v29  ;;  %v208_v44 = vld [vmem:[%s795_s30 + $0xb0] sm:$0xff] }
  0x25   : > { %v338_v1 = vsel %vm219_vm1, %v300_v52, 0.0  ;;  %v249_v5 = vsel %vm219_vm1, %v201_v2, 0.0  ;;  %v303_v6 = vmul.f32 %v196_v36, %v196_v36  ;;  %v340_v7 = vsel %vm219_vm1, %v301_v58, 0.0 }
  0x26   : > { %v232_v26 = vadd.f32 %v231_v18, %v230_v20  ;;  %v333_v56 = vadd.f32 %v332_v47, %v331_v50  ;;  %v251_v11 = vsel %vm219_vm1, %v202_v8, 0.0  ;;  %v304_v12 = vmul.f32 %v197_v42, %v197_v42  ;;  %v204_v20 = vld [vmem:[%s795_s30 + $0x90] sm:$0xff]  ;;  %v209_v50 = vld [vmem:[%s795_s30 + $0xb8] sm:$0xff] }
  0x27   : > { %v342_v13 = vsel %vm219_vm1, %v302_v0, 0.0  ;;  %v253_v17 = vsel %vm219_vm1, %v203_v14, 0.0  ;;  %v305_v18 = vmul.f32 %v198_v48, %v198_v48  ;;  %v344_v19 = vsel %vm219_vm1, %v303_v6, 0.0 }
  0x28   : > { %v234_v30 = vadd.f32 %v233_v22, %v232_v26  ;;  %v335_v62 = vadd.f32 %v334_v53, %v333_v56  ;;  %v255_v23 = vsel %vm219_vm1, %v204_v20, 0.0  ;;  %v306_v24 = vmul.f32 %v199_v54, %v199_v54  ;;  %v205_v26 = vld [vmem:[%s795_s30 + $0x98] sm:$0xff]  ;;  %v210_v56 = vld [vmem:[%s795_s30 + $0xc0] sm:$0xff] }
  0x29   : > { %v346_v25 = vsel %vm219_vm1, %v304_v12, 0.0  ;;  %v257_v29 = vsel %vm219_vm1, %v205_v26, 0.0  ;;  %v348_v31 = vsel %vm219_vm1, %v305_v18, 0.0  ;;  %v308_v36 = vmul.f32 %v201_v2, %v201_v2 }
  0x2a   : > { %v236_v37 = vadd.f32 %v235_v27, %v234_v30  ;;  %v337_v4 = vadd.f32 %v336_v59, %v335_v62  ;;  %v307_v30 = vmul.f32 %v200_v60, %v200_v60  ;;  %v261_v41 = vsel %vm219_vm1, %v207_v38, 0.0  ;;  %v211_v62 = vld [vmem:[%s795_s30 + $0xc8] sm:$0xff] }
  0x2b   : > { %v309_v42 = vmul.f32 %v202_v8, %v202_v8  ;;  %v263_v47 = vsel %vm219_vm1, %v208_v44, 0.0  ;;  %v310_v48 = vmul.f32 %v203_v14, %v203_v14  ;;  %v265_v53 = vsel %vm219_vm1, %v209_v50, 0.0 }
  0x2c   : > { %v238_v43 = vadd.f32 %v237_v32, %v236_v37  ;;  %v339_v10 = vadd.f32 %v338_v1, %v337_v4  ;;  %v206_v32 = vld [vmem:[%s795_s30 + $0xa0] sm:$0xff]  ;;  %v350_v37 = vsel %vm219_vm1, %v306_v24, 0.0  ;;  %v311_v54 = vmul.f32 %v204_v20, %v204_v20  ;;  %v212_v4 = vld [vmem:[%s795_s30 + $0xd0] sm:$0xff] }
  0x2d   : > { %v259_v35 = vsel %vm219_vm1, %v206_v32, 0.0  ;;  %v267_v59 = vsel %vm219_vm1, %v210_v56, 0.0  ;;  %v312_v60 = vmul.f32 %v205_v26, %v205_v26  ;;  %v269_v1 = vsel %vm219_vm1, %v211_v62, 0.0 }
  0x2e   : > { %v240_v49 = vadd.f32 %v239_v39, %v238_v43  ;;  %v341_v16 = vadd.f32 %v340_v7, %v339_v10  ;;  %v352_v43 = vsel %vm219_vm1, %v307_v30, 0.0  ;;  %v313_v2 = vmul.f32 %v206_v32, %v206_v32  ;;  %v213_v10 = vld [vmem:[%s795_s30 + $0xd8] sm:$0xff] }
  0x2f   : > { %v271_v7 = vsel %vm219_vm1, %v212_v4, 0.0  ;;  %v314_v8 = vmul.f32 %v207_v38, %v207_v38  ;;  %v315_v14 = vmul.f32 %v208_v44, %v208_v44  ;;  %v316_v20 = vmul.f32 %v209_v50, %v209_v50 }
  0x30   : > { %v242_v55 = vadd.f32 %v241_v45, %v240_v49  ;;  %v343_v22 = vadd.f32 %v342_v13, %v341_v16  ;;  %v354_v49 = vsel %vm219_vm1, %v308_v36, 0.0  ;;  %v273_v13 = vsel %vm219_vm1, %v213_v10, 0.0  ;;  %v214_v16 = vld [vmem:[%s795_s30 + $0xe0] sm:$0xff] }
  0x31   : > { %v317_v26 = vmul.f32 %v210_v56, %v210_v56  ;;  %v318_v32 = vmul.f32 %v211_v62, %v211_v62  ;;  %v319_v38 = vmul.f32 %v212_v4, %v212_v4 }
  0x32   : > { %v244_v61 = vadd.f32 %v243_v51, %v242_v55  ;;  %v345_v28 = vadd.f32 %v344_v19, %v343_v22  ;;  %v356_v55 = vsel %vm219_vm1, %v309_v42, 0.0  ;;  %v275_v19 = vsel %vm219_vm1, %v214_v16, 0.0  ;;  %v215_v22 = vld [vmem:[%s795_s30 + $0xe8] sm:$0xff] }
  0x33   : > { %v320_v42 = vmul.f32 %v213_v10, %v213_v10  ;;  %v322_v50 = vmul.f32 %v215_v22, %v215_v22 }
  0x34   : > { %v246_v3 = vadd.f32 %v245_v57, %v244_v61  ;;  %v347_v34 = vadd.f32 %v346_v25, %v345_v28  ;;  %v358_v61 = vsel %vm219_vm1, %v310_v48, 0.0  ;;  %v277_v25 = vsel %vm219_vm1, %v215_v22, 0.0  ;;  %v216_v28 = vld [vmem:[%s795_s30 + $0xf0] sm:$0xff] }
  0x36   : > { %v248_v9 = vadd.f32 %v247_v63, %v246_v3  ;;  %v349_v40 = vadd.f32 %v348_v31, %v347_v34  ;;  %v360_v3 = vsel %vm219_vm1, %v311_v54, 0.0  ;;  %v279_v31 = vsel %vm219_vm1, %v216_v28, 0.0  ;;  %v217_v34 = vld [vmem:[%s795_s30 + $0xf8] sm:$0xff] }
  0x37   : > { %v323_v54 = vmul.f32 %v216_v28, %v216_v28 }
  0x38   : > { %v250_v15 = vadd.f32 %v249_v5, %v248_v9  ;;  %v351_v46 = vadd.f32 %v350_v37, %v349_v40  ;;  %v362_v9 = vsel %vm219_vm1, %v312_v60, 0.0  ;;  %v281_v37 = vsel %vm219_vm1, %v217_v34, 0.0 }
  0x39   : > { %v384_v62 = vsel %vm219_vm1, %v323_v54, 0.0 }
  0x3a   : > { %v252_v21 = vadd.f32 %v251_v11, %v250_v15  ;;  %v353_v52 = vadd.f32 %v352_v43, %v351_v46  ;;  %v364_v15 = vsel %vm219_vm1, %v313_v2, 0.0  ;;  %v374_v43 = vsel %vm219_vm1, %v318_v32, 0.0 }
  0x3b   : > { %v321_v46 = vmul.f32 %v214_v16, %v214_v16 }
  0x3c   : > { %v254_v27 = vadd.f32 %v253_v17, %v252_v21  ;;  %v355_v58 = vadd.f32 %v354_v49, %v353_v52  ;;  %v366_v21 = vsel %vm219_vm1, %v314_v8, 0.0 }
  0x3e   : > { %v256_v33 = vadd.f32 %v255_v23, %v254_v27  ;;  %v357_v0 = vadd.f32 %v356_v55, %v355_v58  ;;  %v368_v27 = vsel %vm219_vm1, %v315_v14, 0.0  ;;  %v380_v55 = vsel %vm219_vm1, %v321_v46, 0.0 }
  0x3f   : > { %v324_v58 = vmul.f32 %v217_v34, %v217_v34 }
  0x40   : > { %v258_v39 = vadd.f32 %v257_v29, %v256_v33  ;;  %v359_v6 = vadd.f32 %v358_v61, %v357_v0  ;;  %v370_v33 = vsel %vm219_vm1, %v316_v20, 0.0 }
  0x41   : > { %v386_v2 = vsel %vm219_vm1, %v324_v58, 0.0 }
  0x42   : > { %v260_v45 = vadd.f32 %v259_v35, %v258_v39  ;;  %v361_v12 = vadd.f32 %v360_v3, %v359_v6  ;;  %v372_v39 = vsel %vm219_vm1, %v317_v26, 0.0 }
  0x44   : > { %v262_v51 = vadd.f32 %v261_v41, %v260_v45  ;;  %v363_v18 = vadd.f32 %v362_v9, %v361_v12 }
  0x46   : > { %v264_v57 = vadd.f32 %v263_v47, %v262_v51  ;;  %v365_v24 = vadd.f32 %v364_v15, %v363_v18  ;;  %v376_v47 = vsel %vm219_vm1, %v319_v38, 0.0  ;;  %v378_v51 = vsel %vm219_vm1, %v320_v42, 0.0 }
  0x48   : > { %v266_v63 = vadd.f32 %v265_v53, %v264_v57  ;;  %v367_v30 = vadd.f32 %v366_v21, %v365_v24 }
  0x4a   : > { %v268_v5 = vadd.f32 %v267_v59, %v266_v63  ;;  %v369_v36 = vadd.f32 %v368_v27, %v367_v30  ;;  %v382_v59 = vsel %vm219_vm1, %v322_v50, 0.0 }
  0x4c   : > { %v270_v11 = vadd.f32 %v269_v1, %v268_v5  ;;  %v371_v41 = vadd.f32 %v370_v33, %v369_v36  ;;  %v218_v1 = vld [vmem:[%s782_s24] sm:$0x1] }
  0x4e   : > { %v272_v17 = vadd.f32 %v271_v7, %v270_v11  ;;  %v373_v45 = vadd.f32 %v372_v39, %v371_v41 }
  0x50   : > { %v274_v23 = vadd.f32 %v273_v13, %v272_v17  ;;  %v375_v49 = vadd.f32 %v374_v43, %v373_v45 }
  0x52   : > { %v276_v29 = vadd.f32 %v275_v19, %v274_v23  ;;  %v377_v53 = vadd.f32 %v376_v47, %v375_v49 }
  0x54   : > { %v278_v35 = vadd.f32 %v277_v25, %v276_v29  ;;  %v379_v57 = vadd.f32 %v378_v51, %v377_v53 }
  0x56   : > { %v280_v40 = vadd.f32 %v279_v31, %v278_v35  ;;  %v381_v61 = vadd.f32 %v380_v55, %v379_v57 }
  0x58   : > { %v282_v44 = vadd.f32 %v281_v37, %v280_v40  ;;  %v383_v0 = vadd.f32 %v382_v59, %v381_v61 }
  0x5a   : > { %v283_v48 = vrot.slane %v282_v44, 4  ;;  %v385_v4 = vadd.f32 %v384_v62, %v383_v0 }
  0x5c   : > { %v284_v52 = vadd.f32 %v283_v48, %v282_v44  ;;  %v387_v6 = vadd.f32 %v386_v2, %v385_v4 }
  0x5e   : > { %v285_v56 = vrot.slane %v284_v52, 2  ;;  %v388_v7 = vrot.slane %v387_v6, 4 }
  0x60   : > { %v286_v60 = vadd.f32 %v285_v56, %v284_v52 }
  0x62   : > { %v287_v63 = vrot.slane %v286_v60, 1 }
  0x64   : > { %v288_v3 = vadd.f32 %v287_v63, %v286_v60 }
  0x66   : > { %v289_v5 = vadd.f32 %v288_v3, %v218_v1 }
  0x68   : > { %291 = vst.msk [vmem:[%s782_s24] sm:$0x1] %vm183_vm0, %v289_v5 }
  0x69   : > { %621 = shalt.err (!%p618_p5)
}
  0x6a   : > { %533 = dma.vmem_to_hbm [thread:$0]  (%p762_p4), %s412_s6, 16, %s414_s7, %s397_s8   ;;  %v389_v8 = vadd.f32 %v388_v7, %v387_v6  ;;  %v292_v12 = vld [vmem:[%s788_s26] sm:$0x1] }
  0x6b   : > { %s422_s30 = scalar_lea.hbm %s955_s2, %s696_s12  ;;  %s424_s3 = sshll.u32 %s788_s26, 4  ;;  %s425_s3 = int_to_ptr.vmem [resolvable:$true] %s424_s3 }
  0x6c   : > { %v390_v9 = vrot.slane %v389_v8, 2  ;;  %s426_s4 = sshll.u32 %s422_s30, 4  ;;  %s401_s5 = scalar_lea.sflag [#allocation5], %s778_s23  ;;  %s427_s4 = int_to_ptr.hbm [resolvable:$true] %s426_s4 }
  0x6d   : > { %s636_s6 = sshra.s32 %s427_s4, 4  ;;  %s642_s15 = scalar_lea.hbm %s955_s2, 2  ;;  %s637_s6 = int_to_ptr.hbm [resolvable:$true] %s636_s6 }
  0x6e   : > { %v391_v10 = vadd.f32 %v390_v9, %v389_v8  ;;  %s638_s7 = scalar_lea.hbm %s637_s6, 1  ;;  %p643_p10 = scmp.lt.s32.totalorder %s637_s6, %s955_s2 }
  0x6f   : > { %p639_p6 = scmp.ne.s32.totalorder %s637_s6, %s638_s7  ;;  %p644_p11 = scmp.lt.s32.totalorder %s642_s15, %s638_s7 }
  0x70   : > { %v392_v11 = vrot.slane %v391_v10, 1 }
  0x71   : > { %p640_p7 = pnand %p639_p6, %p762_p4  ;;  %p645_p12 = por %p644_p11, %p643_p10 }
  0x72   : > { %v393_v13 = vadd.f32 %v392_v11, %v391_v10 }
  0x73   : > { %p641_p9 = pneg %p640_p7 }
  0x74   : > { %v394_v14 = vadd.f32 %v393_v13, %v292_v12 }
  0x75   : > { %p646_p13 = pnand %p645_p12, %p641_p9 }
  0x76   : > { %395 = vst.msk [vmem:[%s788_s26] sm:$0x1] %vm183_vm0, %v394_v14 }
  0x77   : > { %649 = shalt.err (!%p646_p13)
}
  0x78   : > { %534 = dma.vmem_to_hbm [thread:$0]  (%p762_p4), %s425_s3, 16, %s427_s4, %s401_s5  }
  0x79 PF: > { %p544_p0 = scmp.ge.s32.totalorder %s704_s14, 2  ;;  %s438_s23 = sand.u32 1, %s684_s9  }
  0x7a   : > { %s439_s26 = scalar_lea.sflag [#allocation3], %s438_s23 }
  0x7b   : > { %p538_p1 = pnand %p544_p0, %p769_p8 }
  0x7d   : > { %p539_p2 = pneg %p538_p1 }
  0x7f   : > { %675 = dma.done.wait (%p539_p2), %s439_s26, 16  }
  0x80   : > { %677 = vsyncadd (%p539_p2), %s439_s26, 4294967280  ;;  %s448_s20 = scalar_lea.sflag [#allocation5], %s438_s23 }
  0x81   : > { %679 = dma.done.wait (%p539_p2), %s448_s20, 16  }
  0x82   : > { %681 = vsyncadd (%p539_p2), %s448_s20, 4294967280  ;;  %s19_s14 = sadd.s32 1, %s704_s14   ;;  %s958_s9 = smov %s688_s10 }
  0x83   : > { %p16_p3 = scmp.ge.s32.totalorder %s19_s14, 4   ;;  %s959_s10 = smov %s692_s11 }
  0x84   : > { %s960_s11 = smov %s775_s22  ;;  %s961_s12 = smov %s700_s13 }
  0x85   : > { %s962_s13 = smov %s964_s17  ;;  %18 = sbr.rel (!%p16_p3) target bundleno = 6 (0x6), region = 80 }
  0x8a   :  { %453 = vsyncpa [#allocation3], 1 }
  0x8b   :  { %455 = vsyncpa [#allocation3 + $0x1], 1 }
  0x8c   :  { %456 = vsyncpa [#allocation5], 1 }
  0x8d   :  { %458 = vsyncpa [#allocation5 + $0x1], 1 }

</bundles_post_ra>
